<compile_context>
chip_gen: v6e
topology: v6e:2x2x1
jax: 0.10.0
libtpu: 0.0.40
codegen_flags: <defaults>
</compile_context>

<pallas_src>
import functools

import jax
import jax.numpy as jnp
from jax.experimental import pallas as pl
from jax.experimental.pallas import tpu as pltpu

HIDDEN = 256


def _round_up(x, m):
    return ((x + m - 1) // m) * m


def _critic_kernel(x_ref, w1_ref, b1_ref, w2_ref, b2_ref, w3_ref, b3_ref, o_ref):
    # Layer 1: Linear + ReLU.  bf16 operands on the MXU, f32 accumulation;
    # bias-add / ReLU in f32 on the VPU.
    h1 = jnp.dot(x_ref[...].astype(jnp.bfloat16), w1_ref[...],
                 preferred_element_type=jnp.float32)
    h1 = jnp.maximum(h1 + b1_ref[...], 0.0)

    # Layer 2: Linear + ReLU.
    h2 = jnp.dot(h1.astype(jnp.bfloat16), w2_ref[...],
                 preferred_element_type=jnp.float32)
    h2 = jnp.maximum(h2 + b2_ref[...], 0.0)

    # Layer 3: out_features == 1 -> skip the MXU (an N=1 matmul wastes the
    # systolic columns and still pays a full push/pop).  VPU multiply +
    # XLU lane reduction instead; bias comes from SMEM as a scalar.
    w3 = w3_ref[...].astype(jnp.float32)                # [1, HIDDEN]
    q = jnp.sum(h2 * w3, axis=-1, keepdims=True) + b3_ref[0, 0]
    o_ref[...] = q.astype(o_ref.dtype)


def critic_forward(x, params, *, block_m=256):
    """x: [B, state_dim] float32 -> [B, 1] float32."""
    w1, b1, w2, b2, w3_row, b3 = params
    B, state_dim = x.shape

    # Batch tile: at most block_m, at least a sublane multiple of 8.
    tm = min(block_m, _round_up(B, 8))
    b_pad = _round_up(B, tm)
    if b_pad != B:
        x = jnp.pad(x, ((0, b_pad - B), (0, 0)))
    grid = (b_pad // tm,)

    const = lambda i: (0, 0)  # weights/biases: same block every step -> resident
    out = pl.pallas_call(
        _critic_kernel,
        out_shape=jax.ShapeDtypeStruct((b_pad, 1), jnp.float32),
        grid=grid,
        in_specs=[
            pl.BlockSpec((tm, state_dim), lambda i: (i, 0)),      # x (pipelined)
            pl.BlockSpec((state_dim, HIDDEN), const),             # w1 (bf16)
            pl.BlockSpec((1, HIDDEN), const),                     # b1 (f32)
            pl.BlockSpec((HIDDEN, HIDDEN), const),                # w2 (bf16)
            pl.BlockSpec((1, HIDDEN), const),                     # b2 (f32)
            pl.BlockSpec((1, HIDDEN), const),                     # w3 row (bf16)
            pl.BlockSpec(memory_space=pltpu.MemorySpace.SMEM),    # b3 scalar
        ],
        out_specs=pl.BlockSpec((tm, 1), lambda i: (i, 0)),
        compiler_params=pltpu.CompilerParams(
            dimension_semantics=("parallel",)),
    )(x, w1, b1, w2, b2, w3_row, b3)
    return out[:B]


def init_critic_params(key, state_dim):
    """PyTorch nn.Linear default init: U(-1/sqrt(fan_in), 1/sqrt(fan_in))."""
    keys = jax.random.split(key, 6)

    def linear_init(kw, kb, fan_in, fan_out):
        bound = 1.0 / jnp.sqrt(jnp.float32(fan_in))
        # stored as [in, out] so the kernel computes x @ W (== x @ W_pt.T)
        w = jax.random.uniform(kw, (fan_in, fan_out), jnp.float32, -bound, bound)
        b = jax.random.uniform(kb, (1, fan_out), jnp.float32, -bound, bound)
        return w, b

    w1, b1 = linear_init(keys[0], keys[1], state_dim, HIDDEN)
    w2, b2 = linear_init(keys[2], keys[3], HIDDEN, HIDDEN)
    w3, b3 = linear_init(keys[4], keys[5], HIDDEN, 1)

    # Kernel storage: bf16 weights (half the HBM->VMEM traffic, single-pass
    # MXU), f32 biases.  w3 is kept as a [1, HIDDEN] row for the VPU/XLU
    # reduction; b3 as a (1, 1) SMEM scalar.
    return (w1.astype(jnp.bfloat16), b1,
            w2.astype(jnp.bfloat16), b2,
            w3.T.astype(jnp.bfloat16), b3.reshape(1, 1))


def critic_reference(x, params):
    """Pure-JAX reference mirroring the kernel's bf16-operand / f32-accum math."""
    w1, b1, w2, b2, w3_row, b3 = params
    h1 = jnp.dot(x.astype(jnp.bfloat16), w1,
                 preferred_element_type=jnp.float32)
    h1 = jnp.maximum(h1 + b1, 0.0)
    h2 = jnp.dot(h1.astype(jnp.bfloat16), w2,
                 preferred_element_type=jnp.float32)
    h2 = jnp.maximum(h2 + b2, 0.0)
    return jnp.sum(h2 * w3_row.astype(jnp.float32), axis=-1, keepdims=True) + b3[0, 0]


if __name__ == "__main__":
    key = jax.random.PRNGKey(0)
    k_params, k_x = jax.random.split(key)

    batch = 8
    state_dim = 16  # small synthetic env observation dim

    params = init_critic_params(k_params, state_dim)
    x = jax.random.normal(k_x, (batch, state_dim), jnp.float32)

    forward = jax.jit(functools.partial(critic_forward, block_m=256))
    out = forward(x, params)
    out = jax.block_until_ready(out)

    ref = critic_reference(x, params)
    assert out.shape == (batch, 1), out.shape
    assert jnp.allclose(out, ref, atol=1e-3, rtol=1e-3), "mismatch vs reference"

    print("KERNEL_OK")
</pallas_src>

<mosaic_0001>
module attributes {stable_mosaic.version = 11 : i64} {
  func.func @_critic_kernel(%arg0: i32, %arg1: memref<8x16xf32, #tpu.memory_space<vmem>>, %arg2: memref<16x256xbf16, #tpu.memory_space<vmem>>, %arg3: memref<1x256xf32, #tpu.memory_space<vmem>>, %arg4: memref<256x256xbf16, #tpu.memory_space<vmem>>, %arg5: memref<1x256xf32, #tpu.memory_space<vmem>>, %arg6: memref<1x256xbf16, #tpu.memory_space<vmem>>, %arg7: memref<1x1xf32, #tpu.memory_space<smem>>, %arg8: memref<8x1xf32, #tpu.memory_space<vmem>>) attributes {dimension_semantics = [#tpu.dimension_semantics<parallel>], iteration_bounds = array<i64: 1>, scalar_prefetch = 0 : i64, scratch_operands = 0 : i64, tpu.core_type = #tpu.core_type<tc>, window_params = [{transform_indices = @transform_0, window_bounds = array<i64: 8, 16>}, {pipeline_mode = #tpu.pipeline_mode<synchronous>, transform_indices = @transform_1, window_bounds = array<i64: 16, 256>}, {pipeline_mode = #tpu.pipeline_mode<synchronous>, transform_indices = @transform_2, window_bounds = array<i64: 1, 256>}, {pipeline_mode = #tpu.pipeline_mode<synchronous>, transform_indices = @transform_3, window_bounds = array<i64: 256, 256>}, {pipeline_mode = #tpu.pipeline_mode<synchronous>, transform_indices = @transform_4, window_bounds = array<i64: 1, 256>}, {pipeline_mode = #tpu.pipeline_mode<synchronous>, transform_indices = @transform_5, window_bounds = array<i64: 1, 256>}, {transform_indices = @transform_6, window_bounds = array<i64: 1, 1>}, {transform_indices = @transform_7, window_bounds = array<i64: 8, 1>}]} {
    %c0 = arith.constant 0 : index
    %c0_0 = arith.constant 0 : index
    %0 = vector.load %arg1[%c0, %c0_0] : memref<8x16xf32, #tpu.memory_space<vmem>>, vector<8x16xf32>
    %1 = arith.truncf %0 : vector<8x16xf32> to vector<8x16xbf16>
    %c0_1 = arith.constant 0 : index
    %c0_2 = arith.constant 0 : index
    %2 = vector.load %arg2[%c0_1, %c0_2] : memref<16x256xbf16, #tpu.memory_space<vmem>>, vector<16x256xbf16>
    %cst = arith.constant dense<0.000000e+00> : vector<8x256xf32>
    %3 = tpu.matmul %1, %2, %cst {dimension_numbers = #tpu.dot_dimension_numbers<[1], [0], [0], [1], [0, 0, 1, 1], [], []>} : vector<8x16xbf16>, vector<16x256xbf16>, vector<8x256xf32> -> vector<8x256xf32>
    %c0_3 = arith.constant 0 : index
    %c0_4 = arith.constant 0 : index
    %4 = vector.load %arg3[%c0_3, %c0_4] : memref<1x256xf32, #tpu.memory_space<vmem>>, vector<1x256xf32>
    %5 = vector.broadcast %4 : vector<1x256xf32> to vector<8x256xf32>
    %6 = arith.addf %3, %5 : vector<8x256xf32>
    %cst_5 = arith.constant 0.000000e+00 : f32
    %7 = vector.broadcast %cst_5 : f32 to vector<8x256xf32>
    %8 = arith.maximumf %6, %7 : vector<8x256xf32>
    %9 = arith.truncf %8 : vector<8x256xf32> to vector<8x256xbf16>
    %c0_6 = arith.constant 0 : index
    %c0_7 = arith.constant 0 : index
    %10 = vector.load %arg4[%c0_6, %c0_7] : memref<256x256xbf16, #tpu.memory_space<vmem>>, vector<256x256xbf16>
    %cst_8 = arith.constant dense<0.000000e+00> : vector<8x256xf32>
    %11 = tpu.matmul %9, %10, %cst_8 {dimension_numbers = #tpu.dot_dimension_numbers<[1], [0], [0], [1], [0, 0, 1, 1], [], []>} : vector<8x256xbf16>, vector<256x256xbf16>, vector<8x256xf32> -> vector<8x256xf32>
    %c0_9 = arith.constant 0 : index
    %c0_10 = arith.constant 0 : index
    %12 = vector.load %arg5[%c0_9, %c0_10] : memref<1x256xf32, #tpu.memory_space<vmem>>, vector<1x256xf32>
    %13 = vector.broadcast %12 : vector<1x256xf32> to vector<8x256xf32>
    %14 = arith.addf %11, %13 : vector<8x256xf32>
    %cst_11 = arith.constant 0.000000e+00 : f32
    %15 = vector.broadcast %cst_11 : f32 to vector<8x256xf32>
    %16 = arith.maximumf %14, %15 : vector<8x256xf32>
    %c0_12 = arith.constant 0 : index
    %c0_13 = arith.constant 0 : index
    %17 = vector.load %arg6[%c0_12, %c0_13] : memref<1x256xbf16, #tpu.memory_space<vmem>>, vector<1x256xbf16>
    %18 = arith.extf %17 : vector<1x256xbf16> to vector<1x256xf32>
    %19 = vector.broadcast %18 : vector<1x256xf32> to vector<8x256xf32>
    %20 = arith.mulf %16, %19 : vector<8x256xf32>
    %cst_14 = arith.constant dense<0.000000e+00> : vector<8xf32>
    %21 = vector.multi_reduction <add>, %20, %cst_14 [1] : vector<8x256xf32> to vector<8xf32>
    %22 = vector.shape_cast %21 : vector<8xf32> to vector<8x1xf32>
    %c0_15 = arith.constant 0 : index
    %c0_16 = arith.constant 0 : index
    %23 = memref.load %arg7[%c0_15, %c0_16] : memref<1x1xf32, #tpu.memory_space<smem>>
    %24 = vector.broadcast %23 : f32 to vector<8x1xf32>
    %25 = arith.addf %22, %24 : vector<8x1xf32>
    %c0_17 = arith.constant 0 : index
    %c0_18 = arith.constant 0 : index
    %26 = vector.load %arg8[%c0_17, %c0_18] : memref<8x1xf32, #tpu.memory_space<vmem>>, vector<8x1xf32>
    tpu.vector_store %arg8[%c0_17, %c0_18], %25 {strides = array<i32>} : memref<8x1xf32, #tpu.memory_space<vmem>>, vector<8x1xf32>,
    return
  }
  func.func @transform_0(%arg0: i32) -> (i32, i32) {
    %c0_i32 = arith.constant 0 : i32
    %c0_i32_0 = arith.constant 0 : i32
    return %arg0, %c0_i32 : i32, i32
  }
  func.func @transform_1(%arg0: i32) -> (i32, i32) {
    %c0_i32 = arith.constant 0 : i32
    %c0_i32_0 = arith.constant 0 : i32
    %c0_i32_1 = arith.constant 0 : i32
    return %c0_i32, %c0_i32_0 : i32, i32
  }
  func.func @transform_2(%arg0: i32) -> (i32, i32) {
    %c0_i32 = arith.constant 0 : i32
    %c0_i32_0 = arith.constant 0 : i32
    %c0_i32_1 = arith.constant 0 : i32
    return %c0_i32, %c0_i32_0 : i32, i32
  }
  func.func @transform_3(%arg0: i32) -> (i32, i32) {
    %c0_i32 = arith.constant 0 : i32
    %c0_i32_0 = arith.constant 0 : i32
    %c0_i32_1 = arith.constant 0 : i32
    return %c0_i32, %c0_i32_0 : i32, i32
  }
  func.func @transform_4(%arg0: i32) -> (i32, i32) {
    %c0_i32 = arith.constant 0 : i32
    %c0_i32_0 = arith.constant 0 : i32
    %c0_i32_1 = arith.constant 0 : i32
    return %c0_i32, %c0_i32_0 : i32, i32
  }
  func.func @transform_5(%arg0: i32) -> (i32, i32) {
    %c0_i32 = arith.constant 0 : i32
    %c0_i32_0 = arith.constant 0 : i32
    %c0_i32_1 = arith.constant 0 : i32
    return %c0_i32, %c0_i32_0 : i32, i32
  }
  func.func @transform_6(%arg0: i32) -> (i32, i32) {
    %c0_i32 = arith.constant 0 : i32
    %c0_i32_0 = arith.constant 0 : i32
    %c0_i32_1 = arith.constant 0 : i32
    return %c0_i32, %c0_i32_0 : i32, i32
  }
  func.func @transform_7(%arg0: i32) -> (i32, i32) {
    %c0_i32 = arith.constant 0 : i32
    %c0_i32_0 = arith.constant 0 : i32
    return %arg0, %c0_i32 : i32, i32
  }
}

</mosaic_0001>

<bundles_post_ra>
// kernel: critic_forward.1
= control target key start
LH: loop header
LB: loop body
LE: loop exit
PB: predicated region body
PF: predicated region fallthrough
CT: control target
= control target key end

     0   :  { %13 = vsyncpa [#allocation4], 0  ;;  %s652_s0 = inlined_call_operand.hbm [shape: f32[8,16], index: 0, kind: input, shape index: {}]   ;;  %s653_s1 = inlined_call_operand.hbm [shape: bf16[16,256], index: 1, kind: input, shape index: {}]   ;;  %s654_s2 = inlined_call_operand.vmem [shape: f32[1,256], index: 2, kind: input, shape index: {}]   ;;  %s655_s3 = inlined_call_operand.hbm [shape: bf16[256,256], index: 3, kind: input, shape index: {}]   ;;  %s656_s4 = inlined_call_operand.vmem [shape: f32[1,256], index: 4, kind: input, shape index: {}]   ;;  %s657_s5 = inlined_call_operand.vmem [shape: bf16[1,256], index: 5, kind: input, shape index: {}]   ;;  %s658_s6 = inlined_call_operand.<no memory space> [shape: f32[1,1], index: 6, kind: input, shape index: {}]   ;;  %s659_s7 = inlined_call_operand.vmem [shape: f32[8,1], index: 7, kind: output, shape index: {}]  }
   0x1   :  { %14 = vsyncpa [#allocation6], 0  ;;  %s582_s24 = smov [#allocation5]  }
   0x2   :  { %s30_s25 = sshll.u32 %s582_s24, 4  ;;  %s31_s25 = int_to_ptr.vmem [resolvable:$true] %s30_s25 }
   0x3   :  { %s526_s26 = scalar_lea.vmem %s31_s25, 256  ;;  %p531_p1 = scmp.lt.s32.totalorder %s31_s25, %s31_s25 }
   0x4   :  { %p527_p0 = scmp.ne.s32.totalorder %s31_s25, %s526_s26  ;;  %p532_p2 = scmp.lt.s32.totalorder %s526_s26, %s526_s26 }
   0x6   :  { %p533_p3 = por %p532_p2, %p531_p1 }
   0x8   :  { %p534_p4 = pnand %p533_p3, %p527_p0 }
   0xa   :  { %537 = shalt.err (!%p534_p4)
}
   0xb   :  { %s583_s27 = smov 128   ;;  %s584_s28 = smov 8  }
   0xc   :  { %36 = dma.hbm_to_vmem [thread:$0]  %s653_s1, 256, %s31_s25, [#allocation6], %s583_s27, %s583_s27, %s584_s28  }
   0xd   :  { %s585_s8 = smov [#allocation3]   ;;  %s586_s10 = smov [#allocation7]  }
   0xe   :  { %s21_s9 = sshll.u32 %s585_s8, 4  ;;  %s44_s11 = sshll.u32 %s586_s10, 4  ;;  %s22_s9 = int_to_ptr.vmem [resolvable:$true] %s21_s9  ;;  %s45_s11 = int_to_ptr.vmem [resolvable:$true] %s44_s11 }
   0xf   :  { %s546_s12 = scalar_lea.vmem %s22_s9, 128  ;;  %p551_p6 = scmp.lt.s32.totalorder %s22_s9, %s22_s9 }
  0x10   :  { %p547_p5 = scmp.ne.s32.totalorder %s22_s9, %s546_s12  ;;  %p552_p7 = scmp.lt.s32.totalorder %s546_s12, %s546_s12 }
  0x12   :  { %p553_p8 = por %p552_p7, %p551_p6 }
  0x14   :  { %p554_p9 = pnand %p553_p8, %p547_p5 }
  0x16   :  { %557 = shalt.err (!%p554_p9)
}
  0x17   :  { %24 = dma.hbm_to_vmem [thread:$0]  %s652_s0, 128, %s22_s9, [#allocation4]  }
  0x18   :  { %s566_s15 = scalar_lea.vmem %s45_s11, 4096  ;;  %p571_p11 = scmp.lt.s32.totalorder %s45_s11, %s45_s11 }
  0x19   :  { %p567_p10 = scmp.ne.s32.totalorder %s45_s11, %s566_s15  ;;  %p572_p12 = scmp.lt.s32.totalorder %s566_s15, %s566_s15 }
  0x1b   :  { %p573_p13 = por %p572_p12, %p571_p11 }
  0x1d   :  { %p574_p0 = pnand %p573_p13, %p567_p10 }
  0x1f   :  { %577 = shalt.err (!%p574_p0)
}
  0x20   :  { %50 = dma.hbm_to_vmem [thread:$0]  %s655_s3, 4096, %s45_s11, [#allocation6], %s583_s27, %s583_s27, %s584_s28  }
  0x21   :  { %578 = dma.done.wait [#allocation4], 128  }
  0x22   :  { %579 = vsyncadd [#allocation4], 4294967168 }
  0x23   :  { %580 = dma.done.wait [#allocation6], 4352  }
  0x24   :  { %581 = vsyncadd [#allocation6], 4294962944  ;;  %v587_v0 = vmov 0   ;;  %v467_v1 = vld [vmem:[#allocation5 + $0x4] ss:$8 sps:$4 sm:$0xff]   ;;  %v67_v3 = vld [vmem:[#allocation3] sm:$0xff]  ;;  %v73_v37 = vlaneseq }
  0x25   :  { %129 = vmatprep.mubr.bf16.mxu0 %v587_v0  ;;  %v469_v2 = vld [vmem:[#allocation5] ss:$8 sps:$4 sm:$0xff]   ;;  %111 = vmatprep.subr.bf16.mxu0 %v467_v1  ;;  %v68_v4 = vpack.c.bf16 %v67_v3, %v67_v3  ;;  %v470_v5 = vld [vmem:[#allocation7 + $0x74] ss:$8 sps:$4 sm:$0xff]   ;;  %vm93_vm0 = vcmask 130048   ;;  %vm418_vm1 = vcmask 7168  }
  0x26   :  { %v472_v6 = vld [vmem:[#allocation7 + $0x70] ss:$8 sps:$4 sm:$0xff]   ;;  %112 = vmatpush1.bf16.msra.mxu0 %v469_v2  ;;  %v473_v7 = vld [vmem:[#allocation7 + $0x64] ss:$8 sps:$4 sm:$0xff]   ;;  %346 = vmatprep.subr.bf16.mxu1 %v470_v5  ;;  %v475_v8 = vld [vmem:[#allocation7 + $0x60] ss:$8 sps:$4 sm:$0xff]  }
  0x27   :  { %347 = vmatpush1.bf16.msra.mxu1 %v472_v6  ;;  %v476_v9 = vld [vmem:[#allocation7 + $0x54] ss:$8 sps:$4 sm:$0xff]   ;;  %v478_v10 = vld [vmem:[#allocation7 + $0x50] ss:$8 sps:$4 sm:$0xff]   ;;  %v479_v11 = vld [vmem:[#allocation7 + $0x44] ss:$8 sps:$4 sm:$0xff]  }
  0x28   :  { %348 = vmatprep.subr.bf16.mxu1 %v473_v7  ;;  %v481_v12 = vld [vmem:[#allocation7 + $0x40] ss:$8 sps:$4 sm:$0xff]   ;;  %v482_v13 = vld [vmem:[#allocation7 + $0x34] ss:$8 sps:$4 sm:$0xff]   ;;  %v484_v14 = vld [vmem:[#allocation7 + $0x30] ss:$8 sps:$4 sm:$0xff]  }
  0x29   :  { %428 = vmatmul.mubr.msk.bf16.vlgmr.msra.gmra.mxu0 %vm93_vm0, %v68_v4  ;;  %v485_v15 = vld [vmem:[#allocation7 + $0x24] ss:$8 sps:$4 sm:$0xff]   ;;  %v487_v16 = vld [vmem:[#allocation7 + $0x20] ss:$8 sps:$4 sm:$0xff]   ;;  %v488_v17 = vld [vmem:[#allocation7 + $0x14] ss:$8 sps:$4 sm:$0xff]  }
  0x2a   :  { %v490_v18 = vld [vmem:[#allocation7 + $0x10] ss:$8 sps:$4 sm:$0xff]   ;;  %v491_v19 = vld [vmem:[#allocation7 + $0x4] ss:$8 sps:$4 sm:$0xff]   ;;  %v493_v20 = vld [vmem:[#allocation7] ss:$8 sps:$4 sm:$0xff]  }
  0x2b   :  { %349 = vmatpush1.bf16.msra.mxu1 %v475_v8  ;;  %v494_v21 = vld [vmem:[#allocation7 + $0xf4] ss:$8 sps:$4 sm:$0xff]   ;;  %v496_v22 = vld [vmem:[#allocation7 + $0xf0] ss:$8 sps:$4 sm:$0xff]   ;;  %v497_v23 = vld [vmem:[#allocation7 + $0xe4] ss:$8 sps:$4 sm:$0xff]  }
  0x2c   :  { %350 = vmatprep.subr.bf16.mxu1 %v476_v9  ;;  %v499_v24 = vld [vmem:[#allocation7 + $0xe0] ss:$8 sps:$4 sm:$0xff]   ;;  %v500_v25 = vld [vmem:[#allocation7 + $0xd4] ss:$8 sps:$4 sm:$0xff]   ;;  %v502_v26 = vld [vmem:[#allocation7 + $0xd0] ss:$8 sps:$4 sm:$0xff]  }
  0x2d   :  { %v503_v27 = vld [vmem:[#allocation7 + $0xc4] ss:$8 sps:$4 sm:$0xff]   ;;  %v505_v28 = vld [vmem:[#allocation7 + $0xc0] ss:$8 sps:$4 sm:$0xff]   ;;  %v506_v29 = vld [vmem:[#allocation7 + $0xb4] ss:$8 sps:$4 sm:$0xff]  }
  0x2e   :  { %v508_v30 = vld [vmem:[#allocation7 + $0xb0] ss:$8 sps:$4 sm:$0xff]   ;;  %v509_v31 = vld [vmem:[#allocation7 + $0xa4] ss:$8 sps:$4 sm:$0xff]   ;;  %v511_v32 = vld [vmem:[#allocation7 + $0xa0] ss:$8 sps:$4 sm:$0xff]  }
  0x2f   :  { %351 = vmatpush1.bf16.msra.mxu1 %v478_v10  ;;  %v512_v33 = vld [vmem:[#allocation7 + $0x94] ss:$8 sps:$4 sm:$0xff]   ;;  %v514_v34 = vld [vmem:[#allocation7 + $0x90] ss:$8 sps:$4 sm:$0xff]   ;;  %v515_v35 = vld [vmem:[#allocation7 + $0x84] ss:$8 sps:$4 sm:$0xff]  }
  0x30   :  { %352 = vmatprep.subr.bf16.mxu1 %v479_v11  ;;  %v517_v36 = vld [vmem:[#allocation7 + $0x80] ss:$8 sps:$4 sm:$0xff]   ;;  %v74_v38 = vshrl.u32 %v73_v37, 7  ;;  %v416_v11 = vstv %s658_s6 }
  0x31   :  { %v71_v40 = vld [vmem:[%s654_s2] sm:$0x3] }
  0x32   :  { %v75_v39 = vsub.s32 0, %v74_v38  ;;  %v79_v41 = vsub.s32 1, %v74_v38  ;;  %v389_v54 = vld [vmem:[%s657_s5] sm:$0x3]  ;;  %v398_v57 = vsub.s32 2, %v74_v38 }
  0x33   :  { %353 = vmatpush1.bf16.msra.mxu1 %v481_v12  ;;  %v174_v55 = vld [vmem:[%s656_s4] sm:$0x3]  ;;  %v390_v56 = vunpack.c.l.bf16 %v389_v54 }
  0x34   :  { %354 = vmatprep.subr.bf16.mxu1 %v482_v13  ;;  %v76_v42 = vrot.slane %v71_v40, %v75_v39  ;;  %v80_v43 = vrot.slane %v71_v40, %v79_v41  ;;  %v179_v58 = vrot.slane %v174_v55, %v75_v39  ;;  %v183_v59 = vrot.slane %v174_v55, %v79_v41 }
  0x35   :  { %v395_v60 = vrot.slane %v390_v56, %v75_v39  ;;  %v399_v61 = vrot.slane %v390_v56, %v398_v57 }
  0x37   :  { %355 = vmatpush1.bf16.msra.mxu1 %v484_v14  ;;  %v405_v3 = vrot.slane %v395_v60, %v75_v39  ;;  %v409_v4 = vrot.slane %v399_v61, %v75_v39 }
  0x38   :  { %356 = vmatprep.subr.bf16.mxu1 %v485_v15 }
  0x3b   :  { %357 = vmatpush1.bf16.msra.mxu1 %v487_v16 }
  0x3c   :  { %358 = vmatprep.subr.bf16.mxu1 %v488_v17 }
  0x3f   :  { %359 = vmatpush1.bf16.msra.mxu1 %v490_v18 }
  0x40   :  { %360 = vmatprep.subr.bf16.mxu1 %v491_v19 }
  0x43   :  { %361 = vmatpush1.bf16.msra.mxu1 %v493_v20 }
  0x44   :  { %362 = vmatprep.subr.bf16.mxu1 %v494_v21 }
  0x47   :  { %363 = vmatpush2.bf16.msra.mxu1 %v496_v22 }
  0x48   :  { %364 = vmatprep.subr.bf16.mxu1 %v497_v23 }
  0x4b   :  { %365 = vmatpush2.bf16.msra.mxu1 %v499_v24 }
  0x4c   :  { %366 = vmatprep.subr.bf16.mxu1 %v500_v25 }
  0x4f   :  { %367 = vmatpush2.bf16.msra.mxu1 %v502_v26 }
  0x50   :  { %368 = vmatprep.subr.bf16.mxu1 %v503_v27 }
  0x53   :  { %369 = vmatpush2.bf16.msra.mxu1 %v505_v28 }
  0x54   :  { %370 = vmatprep.subr.bf16.mxu1 %v506_v29 }
  0x57   :  { %371 = vmatpush2.bf16.msra.mxu1 %v508_v30 }
  0x58   :  { %372 = vmatprep.subr.bf16.mxu1 %v509_v31 }
  0x5b   :  { %373 = vmatpush2.bf16.msra.mxu1 %v511_v32 }
  0x5c   :  { %374 = vmatprep.subr.bf16.mxu1 %v512_v33 }
  0x5f   :  { %375 = vmatpush2.bf16.msra.mxu1 %v514_v34 }
  0x60   :  { %376 = vmatprep.subr.bf16.mxu1 %v515_v35 }
  0x63   :  { %377 = vmatpush2.bf16.msra.mxu1 %v517_v36 }
  0xe9   :  { %v131_v44 = vpop.f32.mrf.mxu0 }
  0xea   :  { %v132_v45 = vadd.f32 %v131_v44, %v76_v42 }
  0xeb   :  { %v133_v46 = vpop.f32.mrf.mxu0 }
  0xec   :  { %v134_v47 = vadd.f32 %v133_v46, %v80_v43  ;;  %v138_v48 = vmax.f32 %v132_v45, 0.0 }
  0xed   :  { %v135_v49 = vpop.f32.mrf.mxu0 }
  0xee   :  { %v139_v50 = vmax.f32 %v134_v47, 0.0  ;;  %v140_v53 = vpack.c.bf16 %v138_v48, %v138_v48 }
  0xef   :  { %v136_v51 = vpop.f32.mrf.mxu0 }
  0xf0   :  { %v141_v52 = vpack.c.bf16 %v139_v50, %v139_v50 }
  0xf2   :  { %378 = vmatprep.mubr.bf16.mxu1 %v141_v52 }
  0xf3   :  { %379 = vmatmul.mubr.bf16.vlgmr.msra.gmra.mxu1 %v140_v53 }
 0x1b3   :  { %v380_v62 = vpop.f32.mrf.mxu1 }
 0x1b4   :  { %v381_v63 = vadd.f32 %v380_v62, %v179_v58 }
 0x1b5   :  { %v382_v0 = vpop.f32.mrf.mxu1 }
 0x1b6   :  { %v387_v1 = vmax.f32 %v381_v63, 0.0  ;;  %v383_v2 = vadd.f32 %v382_v0, %v183_v59 }
 0x1b7   :  { %v384_v5 = vpop.f32.mrf.mxu1 }
 0x1b8   :  { %v388_v6 = vmax.f32 %v383_v2, 0.0  ;;  %v410_v8 = vmul.f32 %v405_v3, %v387_v1 }
 0x1b9   :  { %v385_v7 = vpop.f32.mrf.mxu1 }
 0x1ba   :  { %v411_v9 = vmul.f32 %v409_v4, %v388_v6 }
 0x1bc   :  { %v412_v10 = vadd.f32 %v411_v9, %v410_v8 }
 0x1be   :  { %413 = vadd.xlane.f32.xlu0 %v412_v10 }
 0x247   :  { %v414_v12 = vpop.xlane.xlu0 %413 }
 0x248   :  { %v417_v13 = vadd.f32 %v416_v11, %v414_v12 }
 0x24a   :  { %419 = vst.msk [vmem:[%s659_s7] sm:$0xff] %vm418_vm1, %v417_v13 }
 0x24b   :  { %424 = vsyncpa [#allocation4], 1 }
 0x24c   :  { %425 = vsyncpa [#allocation6], 1 }

</bundles_post_ra>
